<compile_context>
chip_gen: v7x
topology: tpu7x:2x2x1
jax: 0.10.0
libtpu: 0.0.40
codegen_flags: <defaults>
</compile_context>

<pallas_src>
import functools

import jax
import jax.numpy as jnp
from jax.experimental import pallas as pl
from jax.experimental.pallas import tpu as pltpu


_VMEM_LIMIT_BYTES = 32 * 1024 * 1024   # explicit scoped-VMEM budget (v7x-safe)


# ------------------------------------------------------------------ helpers --

def _clamp_tile(dim, target):
    """Full dim when small, otherwise the aligned target.  pl.cdiv grids +
    Pallas boundary masking handle any remainder (no divisor hunting)."""
    return dim if dim <= target else target


def _contract_tile(k, target):
    """Contraction tiles must cover K exactly (boundary padding would corrupt
    the accumulation), so pick target if it divides, else a 128-multiple
    divisor, else the full K."""
    if k <= target:
        return k
    if k % target == 0:
        return target
    for t in range(target, 127, -128):
        if k % t == 0:
            return t
    return k


def _mosaic_params(*semantics):
    return pltpu.CompilerParams(
        dimension_semantics=semantics,
        vmem_limit_bytes=_VMEM_LIMIT_BYTES)


def _heads_per_group(num_heads, head_dim):
    """Largest head group whose lane width is <=128 (aligned loads/stores)."""
    if num_heads * head_dim <= 128:
        return num_heads
    hpg = max(1, 128 // head_dim)
    while num_heads % hpg:
        hpg -= 1
    return hpg


# ------------------------------------------------------------------ kernels --

def _linear_kernel(x_ref, w_ref, b_ref, o_ref, acc_ref, *, activation):
    @pl.when(pl.program_id(2) == 0)
    def _():
        acc_ref[...] = jnp.zeros_like(acc_ref)

    acc_ref[...] += jnp.dot(x_ref[...], w_ref[...],
                            preferred_element_type=jnp.float32)

    @pl.when(pl.program_id(2) == pl.num_programs(2) - 1)
    def _():
        y = acc_ref[...] + b_ref[...].astype(jnp.float32)
        if activation == "quick_gelu":
            y = y * jax.nn.sigmoid(1.702 * y)
        o_ref[...] = y.astype(o_ref.dtype)


def _linear_res_kernel(x_ref, w_ref, b_ref, res_ref, o_ref, acc_ref, *, activation):
    @pl.when(pl.program_id(2) == 0)
    def _():
        acc_ref[...] = jnp.zeros_like(acc_ref)

    acc_ref[...] += jnp.dot(x_ref[...], w_ref[...],
                            preferred_element_type=jnp.float32)

    @pl.when(pl.program_id(2) == pl.num_programs(2) - 1)
    def _():
        y = acc_ref[...] + b_ref[...].astype(jnp.float32)
        if activation == "quick_gelu":
            y = y * jax.nn.sigmoid(1.702 * y)
        y = y + res_ref[...].astype(jnp.float32)        # fused residual add
        o_ref[...] = y.astype(o_ref.dtype)


def _ln_linear_kernel(x_ref, g_ref, bln_ref, w_ref, b_ref, o_ref, xn_ref,
                      *, eps, activation):
    # LayerNorm prologue is computed once per row-block (j == 0) and cached in
    # a VMEM scratch as bf16 MXU operands; subsequent column blocks reuse it.
    @pl.when(pl.program_id(1) == 0)
    def _():
        x = x_ref[...].astype(jnp.float32)
        mu = jnp.mean(x, axis=-1, keepdims=True)
        var = jnp.mean(x * x, axis=-1, keepdims=True) - mu * mu   # one-pass
        xn = (x - mu) * jax.lax.rsqrt(var + eps)
        xn = xn * g_ref[...].astype(jnp.float32) + bln_ref[...].astype(jnp.float32)
        xn_ref[...] = xn.astype(xn_ref.dtype)

    y = jnp.dot(xn_ref[...], w_ref[...], preferred_element_type=jnp.float32)
    y = y + b_ref[...].astype(jnp.float32)
    if activation == "quick_gelu":
        y = y * jax.nn.sigmoid(1.702 * y)
    o_ref[...] = y.astype(o_ref.dtype)


def _layernorm_kernel(x_ref, g_ref, b_ref, o_ref, *, eps):
    x = x_ref[...].astype(jnp.float32)
    mu = jnp.mean(x, axis=-1, keepdims=True)
    var = jnp.mean(x * x, axis=-1, keepdims=True) - mu * mu       # one-pass
    y = (x - mu) * jax.lax.rsqrt(var + eps)
    y = y * g_ref[...].astype(jnp.float32) + b_ref[...].astype(jnp.float32)
    o_ref[...] = y.astype(o_ref.dtype)


def _patch_embed_kernel(x_ref, w_ref, pos_ref, o_ref):
    # patch embedding (no bias) with fused positional-embedding add
    y = jnp.dot(x_ref[0], w_ref[...], preferred_element_type=jnp.float32)
    y = y + pos_ref[...].astype(jnp.float32)
    o_ref[0] = y.astype(o_ref.dtype)


def _attn_kernel(qkv_ref, o_ref, *, num_heads, head_dim, heads_per_group):
    # One batch per grid step.  Heads are processed in 128-lane-aligned groups:
    # q/k/v group slabs are sliced from the ref (never the whole (S,3D) block),
    # each group's output is stored directly at an aligned lane offset.
    # The 1/sqrt(head_dim) scale is pre-folded into the Q weights/bias.
    D = num_heads * head_dim
    gw = heads_per_group * head_dim
    for g in range(0, num_heads, heads_per_group):
        lo = g * head_dim
        qg = qkv_ref[0, :, lo:lo + gw]
        kg = qkv_ref[0, :, D + lo:D + lo + gw]
        vg = qkv_ref[0, :, 2 * D + lo:2 * D + lo + gw]
        outs = []
        for hh in range(heads_per_group):
            a = hh * head_dim
            q = qg[:, a:a + head_dim]
            k = kg[:, a:a + head_dim]
            v = vg[:, a:a + head_dim]
            s = jax.lax.dot_general(q, k, (((1,), (1,)), ((), ())),
                                    preferred_element_type=jnp.float32)
            m = jnp.max(s, axis=-1, keepdims=True)
            p = jnp.exp(s - m)
            l = jnp.sum(p, axis=-1, keepdims=True)
            o = jnp.dot(p.astype(v.dtype), v, preferred_element_type=jnp.float32)
            o = o * pl.reciprocal(l, approx=True)      # EUP, normalize after PV
            outs.append(o)
        og = outs[0] if len(outs) == 1 else jnp.concatenate(outs, axis=-1)
        o_ref[0, :, lo:lo + gw] = og.astype(o_ref.dtype)


# ----------------------------------------------------------------- wrappers --

def pallas_linear(x, w, b, residual=None, activation=None,
                  tm=512, tn=512, tk=1024):
    M, K = x.shape
    N = w.shape[1]
    tm = _clamp_tile(M, tm)
    tn = _clamp_tile(N, tn)
    tk = _contract_tile(K, tk)
    grid = (pl.cdiv(M, tm), pl.cdiv(N, tn), K // tk)

    x_spec = pl.BlockSpec((tm, tk), lambda i, j, k: (i, k))
    w_spec = pl.BlockSpec((tk, tn), lambda i, j, k: (k, j))
    b_spec = pl.BlockSpec((1, tn), lambda i, j, k: (0, j))
    o_spec = pl.BlockSpec((tm, tn), lambda i, j, k: (i, j))

    if residual is not None:
        kernel = functools.partial(_linear_res_kernel, activation=activation)
        in_specs = [x_spec, w_spec, b_spec,
                    pl.BlockSpec((tm, tn), lambda i, j, k: (i, j))]
        args = (x, w, b.reshape(1, N), residual)
    else:
        kernel = functools.partial(_linear_kernel, activation=activation)
        in_specs = [x_spec, w_spec, b_spec]
        args = (x, w, b.reshape(1, N))

    return pl.pallas_call(
        kernel,
        out_shape=jax.ShapeDtypeStruct((M, N), x.dtype),
        grid=grid,
        in_specs=in_specs,
        out_specs=o_spec,
        scratch_shapes=[pltpu.VMEM((tm, tn), jnp.float32)],
        compiler_params=_mosaic_params("parallel", "parallel", "arbitrary"),
    )(*args)


def pallas_ln_linear(x, gamma, beta, w, b, activation=None, eps=1e-5,
                     tm=512, tn=512):
    M, K = x.shape
    N = w.shape[1]
    tm = _clamp_tile(M, tm)
    tn = _clamp_tile(N, tn)
    grid = (pl.cdiv(M, tm), pl.cdiv(N, tn))
    return pl.pallas_call(
        functools.partial(_ln_linear_kernel, eps=eps, activation=activation),
        out_shape=jax.ShapeDtypeStruct((M, N), x.dtype),
        grid=grid,
        in_specs=[
            pl.BlockSpec((tm, K), lambda i, j: (i, 0)),
            pl.BlockSpec((1, K), lambda i, j: (0, 0)),
            pl.BlockSpec((1, K), lambda i, j: (0, 0)),
            pl.BlockSpec((K, tn), lambda i, j: (0, j)),
            pl.BlockSpec((1, tn), lambda i, j: (0, j)),
        ],
        out_specs=pl.BlockSpec((tm, tn), lambda i, j: (i, j)),
        scratch_shapes=[pltpu.VMEM((tm, K), x.dtype)],     # cached LN output
        # j (column) axis must stay sequential per row-block so the cached LN
        # scratch written at j==0 is valid for all later j.
        compiler_params=_mosaic_params("parallel", "arbitrary"),
    )(x, gamma.reshape(1, K), beta.reshape(1, K), w, b.reshape(1, N))


def pallas_layernorm(x, gamma, beta, eps, tm=1024):
    M, D = x.shape
    tm = _clamp_tile(M, tm)
    return pl.pallas_call(
        functools.partial(_layernorm_kernel, eps=eps),
        out_shape=jax.ShapeDtypeStruct((M, D), x.dtype),
        grid=(pl.cdiv(M, tm),),
        in_specs=[
            pl.BlockSpec((tm, D), lambda i: (i, 0)),
            pl.BlockSpec((1, D), lambda i: (0, 0)),
            pl.BlockSpec((1, D), lambda i: (0, 0)),
        ],
        out_specs=pl.BlockSpec((tm, D), lambda i: (i, 0)),
        compiler_params=_mosaic_params("parallel"),
    )(x, gamma.reshape(1, D), beta.reshape(1, D))


def pallas_patch_embed(x, w, pos, tr=256, tn=512):
    """x: (B, N, n_pixels); w: (n_pixels, D); pos: (N, D) patch pos-embeddings."""
    B, N, Dpix = x.shape
    Demb = w.shape[1]
    tr = _clamp_tile(N, tr)
    tn = _clamp_tile(Demb, tn)
    return pl.pallas_call(
        _patch_embed_kernel,
        out_shape=jax.ShapeDtypeStruct((B, N, Demb), x.dtype),
        grid=(B, pl.cdiv(N, tr), pl.cdiv(Demb, tn)),
        in_specs=[
            pl.BlockSpec((1, tr, Dpix), lambda b, i, j: (b, i, 0)),
            pl.BlockSpec((Dpix, tn), lambda b, i, j: (0, j)),
            pl.BlockSpec((tr, tn), lambda b, i, j: (i, j)),
        ],
        out_specs=pl.BlockSpec((1, tr, tn), lambda b, i, j: (b, i, j)),
        compiler_params=_mosaic_params("parallel", "parallel", "parallel"),
    )(x, w, pos)


def pallas_attention(qkv, num_heads, head_dim):
    """qkv: (B, S, 3*D) fused projections -> (B, S, D) attention output."""
    B, S, threeD = qkv.shape
    D = num_heads * head_dim
    hpg = _heads_per_group(num_heads, head_dim)
    return pl.pallas_call(
        functools.partial(_attn_kernel, num_heads=num_heads,
                          head_dim=head_dim, heads_per_group=hpg),
        out_shape=jax.ShapeDtypeStruct((B, S, D), qkv.dtype),
        grid=(B,),
        in_specs=[pl.BlockSpec((1, S, threeD), lambda b: (b, 0, 0))],
        out_specs=pl.BlockSpec((1, S, D), lambda b: (b, 0, 0)),
        compiler_params=_mosaic_params("parallel"),
    )(qkv)


# --------------------------------------------------------------- the module --

def make_params(key, cfg):
    D = cfg["emb"]
    mlp = cfg["mlp"]
    n_pixels = cfg["patch_size"] * cfg["patch_size"] * 3
    dtype = cfg.get("dtype", jnp.bfloat16)
    scale = D ** (-0.5)
    qk_scale = (D // cfg["heads"]) ** (-0.5)     # folded into Q weights/bias

    def nrm(k, shape, s=0.02):
        return jax.random.normal(k, shape, dtype=jnp.float32) * s

    keys = jax.random.split(key, 3 + cfg["layers"] * 8)
    params = {
        "class_emb": nrm(keys[0], (D,), scale).astype(dtype),
        "pos_emb": nrm(keys[1], (cfg["num_pos"], D), scale).astype(dtype),
        "patch_w": nrm(keys[2], (n_pixels, D)).astype(dtype),
        "pre_ln_g": jnp.ones((D,), dtype),
        "pre_ln_b": jnp.zeros((D,), dtype),
        "layers": [],
    }
    kidx = 3
    for _ in range(cfg["layers"]):
        lk = keys[kidx:kidx + 8]
        kidx += 8
        wq, wk, wv = nrm(lk[0], (D, D)), nrm(lk[1], (D, D)), nrm(lk[2], (D, D))
        bq = jnp.zeros((D,), jnp.float32) * qk_scale
        bk = jnp.zeros((D,), jnp.float32)
        bv = jnp.zeros((D,), jnp.float32)
        layer = {
            "attn_ln_g": jnp.ones((D,), dtype),
            "attn_ln_b": jnp.zeros((D,), dtype),
            # fused Q/K/V weight (one (D, 3D) MXU pass); 1/sqrt(Dh) pre-folded
            # into the Q columns so the attention kernel does no scaling.
            "wqkv": jnp.concatenate([wq * qk_scale, wk, wv], axis=1).astype(dtype),
            "bqkv": jnp.concatenate([bq, bk, bv]).astype(dtype),
            "wo": nrm(lk[3], (D, D)).astype(dtype),
            "bo": jnp.zeros((D,), dtype),
            "ffn_ln_g": jnp.ones((D,), dtype),
            "ffn_ln_b": jnp.zeros((D,), dtype),
            "w1": nrm(lk[4], (D, mlp)).astype(dtype),
            "b1": nrm(lk[5], (mlp,)).astype(dtype),
            "w2": nrm(lk[6], (mlp, D)).astype(dtype),
            "b2": nrm(lk[7], (D,)).astype(dtype),
        }
        params["layers"].append(layer)
    return params


def vision_transformer_forward(x, params, cfg):
    """x: (B, num_patch, n_pixels) -> list of hidden states, each (B, S, D)."""
    B, N, _ = x.shape
    D = cfg["emb"]
    H = cfg["heads"]
    Dh = D // H
    eps = cfg["eps"]
    dtype = params["patch_w"].dtype
    x = x.astype(dtype)
    S = N + 1

    # patch embedding (Linear, no bias) with fused positional-embedding add.
    # Patch row i gets pos_emb[i + 1] (row 0 is the class-token position).
    # TODO(synk): bicubic antialiased interpolation of pos_emb for mismatched
    # patch grids (F.interpolate) has no clean Pallas equivalent; not needed here.
    patches = pallas_patch_embed(x, params["patch_w"], params["pos_emb"][1:])

    # class token row = class_embedding + pos_emb[0] (tiny, done at XLA level)
    cls_row = (params["class_emb"] + params["pos_emb"][0]).reshape(1, 1, D)
    h = jnp.concatenate(
        [jnp.broadcast_to(cls_row, (B, 1, D)).astype(dtype), patches], axis=1)

    # pre-LN (standalone: its output IS the residual stream)
    h_flat = pallas_layernorm(h.reshape(B * S, D),
                              params["pre_ln_g"], params["pre_ln_b"], eps)

    hidden_states = []
    for layer in params["layers"]:
        # --- attention block: fused(attn_ln + QKV) -> attention -> fused(wo + residual)
        qkv = pallas_ln_linear(h_flat, layer["attn_ln_g"], layer["attn_ln_b"],
                               layer["wqkv"], layer["bqkv"], eps=eps)
        attn = pallas_attention(qkv.reshape(B, S, 3 * D), H, Dh)
        h_flat = pallas_linear(attn.reshape(B * S, D), layer["wo"], layer["bo"],
                               residual=h_flat)

        # --- MLP block: fused(ffn_ln + w1 + quick_gelu) -> fused(w2 + residual)
        m = pallas_ln_linear(h_flat, layer["ffn_ln_g"], layer["ffn_ln_b"],
                             layer["w1"], layer["b1"],
                             activation="quick_gelu", eps=eps)
        h_flat = pallas_linear(m, layer["w2"], layer["b2"], residual=h_flat)

        hidden_states.append(h_flat.reshape(B, S, D))
    return hidden_states


# -------------------------------------------------------------------- main --

if __name__ == "__main__":
    # small synthetic config (structure mirrors VisionBackboneConfig)
    cfg = {
        "patch_size": 2,        # n_pixels = 2*2*3 = 12
        "emb": 64,
        "heads": 4,             # head_dim = 16
        "layers": 2,
        "mlp": 128,
        "num_pos": 17,          # 1 cls + 4*4 patches
        "eps": 1e-5,
        "dtype": jnp.bfloat16,  # bf16 MXU operands, f32 accumulation/stats
    }
    B = 2
    num_patch = 16              # (4, 4) patch grid
    n_pixels = cfg["patch_size"] * cfg["patch_size"] * 3

    key = jax.random.PRNGKey(0)
    kx, kp = jax.random.split(key)
    x = jax.random.normal(kx, (B, num_patch, n_pixels), dtype=jnp.float32)
    params = make_params(kp, cfg)

    hidden_states = vision_transformer_forward(x, params, cfg)
    hidden_states = jax.block_until_ready(hidden_states)

    assert len(hidden_states) == cfg["layers"]
    for hs in hidden_states:
        assert hs.shape == (B, num_patch + 1, cfg["emb"])
        assert bool(jnp.all(jnp.isfinite(hs.astype(jnp.float32))))

    print("KERNEL_OK")
</pallas_src>

<mosaic_0001>
module attributes {stable_mosaic.version = 11 : i64} {
  func.func @_patch_embed_kernel(%arg0: i32, %arg1: i32, %arg2: i32, %arg3: memref<1x16x12xbf16, #tpu.memory_space<vmem>>, %arg4: memref<12x64xbf16, #tpu.memory_space<vmem>>, %arg5: memref<16x64xbf16, #tpu.memory_space<vmem>>, %arg6: memref<1x16x64xbf16, #tpu.memory_space<vmem>>) attributes {dimension_semantics = [#tpu.dimension_semantics<parallel>, #tpu.dimension_semantics<parallel>, #tpu.dimension_semantics<parallel>], iteration_bounds = array<i64: 2, 1, 1>, scalar_prefetch = 0 : i64, scratch_operands = 0 : i64, tpu.core_type = #tpu.core_type<tc>, window_params = [{transform_indices = @transform_0, window_bounds = array<i64: 1, 16, 12>}, {transform_indices = @transform_1, window_bounds = array<i64: 12, 64>}, {transform_indices = @transform_2, window_bounds = array<i64: 16, 64>}, {transform_indices = @transform_3, window_bounds = array<i64: 1, 16, 64>}]} {
    %c0 = arith.constant 0 : index
    %c0_0 = arith.constant 0 : index
    %c0_1 = arith.constant 0 : index
    %0 = vector.load %arg3[%c0, %c0_0, %c0_1] : memref<1x16x12xbf16, #tpu.memory_space<vmem>>, vector<1x16x12xbf16>
    %1 = vector.shape_cast %0 : vector<1x16x12xbf16> to vector<16x12xbf16>
    %c0_2 = arith.constant 0 : index
    %c0_3 = arith.constant 0 : index
    %2 = vector.load %arg4[%c0_2, %c0_3] : memref<12x64xbf16, #tpu.memory_space<vmem>>, vector<12x64xbf16>
    %cst = arith.constant dense<0.000000e+00> : vector<16x64xf32>
    %3 = tpu.matmul %1, %2, %cst {dimension_numbers = #tpu.dot_dimension_numbers<[1], [0], [0], [1], [0, 0, 1, 1], [], []>} : vector<16x12xbf16>, vector<12x64xbf16>, vector<16x64xf32> -> vector<16x64xf32>
    %c0_4 = arith.constant 0 : index
    %c0_5 = arith.constant 0 : index
    %4 = vector.load %arg5[%c0_4, %c0_5] : memref<16x64xbf16, #tpu.memory_space<vmem>>, vector<16x64xbf16>
    %5 = arith.extf %4 : vector<16x64xbf16> to vector<16x64xf32>
    %6 = arith.addf %3, %5 : vector<16x64xf32>
    %7 = arith.truncf %6 : vector<16x64xf32> to vector<16x64xbf16>
    %c0_6 = arith.constant 0 : index
    %c0_7 = arith.constant 0 : index
    %c0_8 = arith.constant 0 : index
    %8 = vector.load %arg6[%c0_6, %c0_7, %c0_8] : memref<1x16x64xbf16, #tpu.memory_space<vmem>>, vector<1x16x64xbf16>
    %9 = vector.shape_cast %8 : vector<1x16x64xbf16> to vector<16x64xbf16>
    %10 = vector.shape_cast %7 : vector<16x64xbf16> to vector<1x16x64xbf16>
    tpu.vector_store %arg6[%c0_6, %c0_7, %c0_8], %10 {strides = array<i32>} : memref<1x16x64xbf16, #tpu.memory_space<vmem>>, vector<1x16x64xbf16>,
    return
  }
  func.func @transform_0(%arg0: i32, %arg1: i32, %arg2: i32) -> (i32, i32, i32) {
    %c0_i32 = arith.constant 0 : i32
    %c0_i32_0 = arith.constant 0 : i32
    return %arg0, %arg1, %c0_i32 : i32, i32, i32
  }
  func.func @transform_1(%arg0: i32, %arg1: i32, %arg2: i32) -> (i32, i32) {
    %c0_i32 = arith.constant 0 : i32
    %c0_i32_0 = arith.constant 0 : i32
    return %c0_i32, %arg2 : i32, i32
  }
  func.func @transform_2(%arg0: i32, %arg1: i32, %arg2: i32) -> (i32, i32) {
    %c0_i32 = arith.constant 0 : i32
    return %arg1, %arg2 : i32, i32
  }
  func.func @transform_3(%arg0: i32, %arg1: i32, %arg2: i32) -> (i32, i32, i32) {
    %c0_i32 = arith.constant 0 : i32
    return %arg0, %arg1, %arg2 : i32, i32, i32
  }
}

</mosaic_0001>

<bundles_post_ra>
// kernel: tpu_custom_call.1
= control target key start
LH: loop header
LB: loop body
LE: loop exit
PB: predicated region body
PF: predicated region fallthrough
CT: control target
= control target key end

     0   :  { %8 = vsyncpa [#allocation3], 0  ;;  %s794_s0 = inlined_call_operand.vmem [shape: bf16[2,16,12], index: 0, kind: input, shape index: {}]   ;;  %s795_s1 = inlined_call_operand.vmem [shape: bf16[12,64], index: 1, kind: input, shape index: {}]   ;;  %s796_s2 = inlined_call_operand.vmem [shape: bf16[16,64], index: 2, kind: input, shape index: {}]   ;;  %s797_s3 = inlined_call_operand.hbm [shape: bf16[2,16,64], index: 3, kind: output, shape index: {}]  }
   0x1   :  { %10 = vsyncpa [#allocation3 + $0x1], 0  ;;  %s673_s12 = smov 0   ;;  %s675_s13 = smov 0  }
   0x2   :  { %s677_s14 = smov 0   ;;  %s679_s15 = smov 0  }
   0x3   :  { %s681_s16 = smov 0   ;;  %s683_s17 = smov 0  }
   0x4 LB: > { %s471_s18 = sadd.s32 4294967295, %s646_s17   ;;  %s472_s19 = sadd.s32 4294967294, %s646_s17   ;;  %s646_s17 = sphi %s683_s17, %s16_s17   ;;  %s642_s16 = sphi %s681_s16, %s804_s16   ;;  %s638_s15 = sphi %s679_s15, %s803_s15   ;;  %s634_s14 = sphi %s677_s14, %s802_s14   ;;  %s630_s13 = sphi %s675_s13, %s801_s13   ;;  %s626_s12 = sphi %s673_s12, %s800_s12  }
   0x5   : > { %s35_s20 = sadd.s32 1, %s642_s16  ;;  %s128_s21 = sadd.s32 1, %s634_s14 }
   0x6   : > { %p37_p0 = scmp.ge.s32.totalorder %s35_s20, 2  ;;  %p138_p1 = scmp.ne.s32.totalorder %s634_s14, %s630_s13 }
   0x7   : > { %p139_p2 = scmp.eq.s32.totalorder %s471_s18, 1  ;;  %p144_p3 = scmp.ne.s32.totalorder %s630_s13, %s626_s12 }
   0x8   : > { %s806_s20 = smov (%p37_p0, %s35_s20), 0  ;;  %p145_p5 = scmp.eq.s32.totalorder %s472_s19, 1 }
   0x9   : > { %p713_p4 = por %p139_p2, %p138_p1  ;;  %s121_s23 = ssub.s32 %s642_s16, %s806_s20 }
   0xa   : > { %p477_p6 = scmp.ge.s32.totalorder %s646_s17, 1  ;;  %p126_p7 = scmp.eq.s32.totalorder %s121_s23, 0 }
   0xb   : > { %p720_p8 = por %p145_p5, %p144_p3  ;;  %p195_p9 = scmp.lt.s32.totalorder %s646_s17, 3 }
   0xc   : > { %s726_s25 = scalar_select %p126_p7, %s634_s14, %s128_s21  }
   0xd   : > { %p196_p10 = pnand %p477_p6, %p195_p9 }
   0xe   : > { %vm282_vm0 = vcmask (!%p196_p10), 1045504   ;;  %v648_v0 = vmov (!%p196_p10), 0.0   ;;  %v566_v1 = vld [vmem:[%s795_s1] sm:$0x3f] (!%p196_p10)   ;;  %p236_p11 = scmp.lt.s32.totalorder (!%p196_p10), %s638_s15, 1  ;;  %vm649_vm1 = vmmov (!%p196_p10), 0  }
   0xf   : > { %199 = sbr.rel (%p196_p10) target bundleno = 260 (0x104), region = 32  ;;  %501 = vmatprep.subr.bf16.mxu0 (!%p196_p10), %v648_v0  ;;  %503 = vmatprep.mubr.msk.bf16.mxu0 (!%p196_p10), %vm649_vm1, %v648_v0  ;;  %v284_v2 = vsel (!%p196_p10), %vm282_vm0, %v566_v1, 0  ;;  %vm278_vm2 = vcmask (!%p196_p10), 97280   ;;  %s232_s6 = sand.u32 (!%p196_p10), 1, %s630_s13   ;;  %v496_v4 = vld [vmem:[%s796_s2] sm:$0xff] (!%p196_p10)   ;;  %vm335_vm3 = vcmask (!%p196_p10), 519168  }
  0x10   : > { %502 = vmatpush3.bf16.msra.mxu0 (!%p196_p10), %v284_v2  ;;  %s478_s9 = sshll.u32 (!%p196_p10), %s232_s6, 3  ;;  %v497_v5 = vunpack.c.l.bf16 (!%p196_p10), %v496_v4  ;;  %v498_v6 = vunpack.c.h.bf16 (!%p196_p10), %v496_v4  ;;  %s494_s18 = sshll.u32 (!%p196_p10), %s638_s15, 7 }
  0x11   : > { %s234_s10 = scalar_lea.vmem (!%p196_p10), [#allocation2], %s478_s9  ;;  %s746_s23 = scalar_lea.hbm (!%p196_p10), %s797_s3, %s494_s18 }
  0x12   : > { %s355_s11 = sshll.u32 (!%p196_p10), %s234_s10, 4  ;;  %s748_s26 = scalar_lea.sflag (!%p196_p10), [#allocation3], %s232_s6  ;;  %s741_s11 = int_to_ptr.vmem [resolvable:$true] %s355_s11 }
  0x13   : > { %s650_s27 = smov (!%p196_p10), [#allocation2]  }
  0x16   : > { %s237_s28 = scalar_select %p236_p11, %s638_s15, 1 }
  0x17   : > { %s568_s15 = scalar_lea.vmem %s741_s11, 128 }
  0x18   : > { %s491_s29 = sshll.u32 %s237_s28, 3  ;;  %p569_p12 = scmp.ne.s32.totalorder %s741_s11, %s568_s15 }
  0x19   : > { %s243_s5 = scalar_lea.vmem %s794_s0, %s491_s29  ;;  %s572_s28 = sshll.u32 %s650_s27, 4  ;;  %s573_s28 = int_to_ptr.vmem [resolvable:$false] %s572_s28 }
  0x1a   : > { %v567_v3 = vld [vmem:[%s243_s5] sm:$0xff]   ;;  %p570_p13 = pnand %p569_p12, %p713_p4  ;;  %s574_s29 = scalar_lea.vmem %s573_s28, 256 }
  0x1b   : > { %504 = vmatmul.mubr.msk.bf16.vlgmr.msra.gmra.mrb[0].mxu0 %vm278_vm2, %v567_v3  ;;  %p575_p1 = scmp.lt.s32.totalorder %s741_s11, %s573_s28  ;;  %p576_p2 = scmp.lt.s32.totalorder %s574_s29, %s568_s15 }
  0x1c   : > { %p571_p0 = pneg %p570_p13 }
  0x1d   : > { %p577_p3 = por %p576_p2, %p575_p1 }
  0x1f   : > { %p578_p5 = pnand %p577_p3, %p571_p0 }
  0xee   : > { %v320_v7 = vpop.f32.mrb[0].mxu0 }
  0xef   : > { %v321_v8 = vadd.f32 %v497_v5, %v320_v7  ;;  %v505_v9 = vpop.f32.mrb[1].mxu0 }
  0xf0   : > { %v323_v10 = vpop.f32.mrb[2].mxu0 }
  0xf1   : > { %v492_v11 = vpack.c.bf16 %v321_v8, %v321_v8  ;;  %v324_v12 = vadd.f32 %v498_v6, %v323_v10  ;;  %v506_v13 = vpop.f32.mrb[3].mxu0 }
  0xf3   : > { %336 = vst.msk [vmem:[%s234_s10] sm:$0xf] %vm335_vm3, %v492_v11  ;;  %v493_v14 = vpack.c.bf16 %v324_v12, %v324_v12 }
  0xf5   : > { %337 = vst.msk [vmem:[%s234_s10 + $0x4] sm:$0xf] %vm335_vm3, %v493_v14 }
  0xf6   : > { %581 = shalt.err (!%p578_p5)
}
  0xf7   : > { %s582_s30 = scalar_lea.hbm %s746_s23, 128  ;;  %s586_s6 = scalar_lea.hbm %s797_s3, 256 }
  0xf8   : > { %p583_p6 = scmp.ne.s32.totalorder %s746_s23, %s582_s30  ;;  %p587_p10 = scmp.lt.u32.totalorder %s746_s23, %s797_s3 }
  0xf9   : > { %p588_p11 = scmp.lt.u32.totalorder %s586_s6, %s582_s30  ;;  %p590_p13 = scmp.lt.u32.totalorder %s582_s30, %s746_s23 }
  0xfa   : > { %p584_p7 = pnand %p583_p6, %p713_p4 }
  0xfb   : > { %p589_p12 = por %p588_p11, %p587_p10 }
  0xfc   : > { %p585_p9 = pneg %p584_p7 }
  0xfd   : > { %p591_p0 = por %p590_p13, %p589_p12 }
  0xff   : > { %p592_p1 = pnand %p591_p0, %p585_p9 }
 0x101   : > { %595 = shalt.err (!%p592_p1)
}
 0x102   : > { %s651_s9 = smov 64   ;;  %s652_s10 = smov 4  }
 0x103   : > { %507 = dma.vmem_to_hbm [thread:$0]  (%p713_p4), %s741_s11, 128, %s746_s23, %s748_s26, %s651_s9, %s651_s9, %s652_s10  }
 0x104 PF: > { %p513_p2 = scmp.ge.s32.totalorder %s646_s17, 2  ;;  %s370_s18 = sand.u32 1, %s626_s12  }
 0x105   : > { %s371_s19 = scalar_lea.sflag [#allocation3], %s370_s18 }
 0x106   : > { %p510_p3 = pnand %p513_p2, %p720_p8 }
 0x108   : > { %621 = dma.done.wait (!%p510_p3), %s371_s19, 128  }
 0x109   : > { %623 = vsyncadd (!%p510_p3), %s371_s19, 4294967168  ;;  %s16_s17 = sadd.s32 1, %s646_s17   ;;  %s800_s12 = smov %s630_s13 }
 0x10a   : > { %p13_p5 = scmp.ge.s32.totalorder %s16_s17, 4   ;;  %s801_s13 = smov %s634_s14 }
 0x10b   : > { %s802_s14 = smov %s726_s25  ;;  %s803_s15 = smov %s642_s16 }
 0x10c   : > { %s804_s16 = smov %s806_s20  ;;  %15 = sbr.rel (!%p13_p5) target bundleno = 4 (0x4), region = 73 }
 0x113   :  { %376 = vsyncpa [#allocation3], 1 }
 0x114   :  { %378 = vsyncpa [#allocation3 + $0x1], 1 }

</bundles_post_ra>
